<compile_context>
chip_gen: v5e
topology: v5e:2x2
jax: 0.10.0
libtpu: 0.0.40
codegen_flags: <defaults>
</compile_context>

<pallas_src>
import functools

import jax
import jax.numpy as jnp
from jax import lax
from jax.experimental import pallas as pl
from jax.experimental.pallas import tpu as pltpu


def _round_up(v, m):
    return -(-v // m) * m


def _pow_p(x, p):
    """x ** p.  Integer p (common case, e.g. p=3) uses VPU multiplies
    (binary exponentiation unrolled at trace time) instead of the single-slot
    EUP exp/log path."""
    if float(p).is_integer() and 1 <= int(p) <= 64:
        e = int(p)
        base, xp = x, None
        while e > 0:
            if e & 1:
                xp = base if xp is None else xp * base
            e >>= 1
            if e:
                base = base * base
        return xp
    return jnp.power(x, p)


def _gem_kernel(x_ref, o_ref, acc_ref, *, p, eps, inv_hw, hw,
                row_tile, hw_tile, acc_w, mask_cols):
    k = pl.program_id(1)           # spatial-chunk index (reduction, "arbitrary")
    n_k = pl.num_programs(1)

    @pl.when(k == 0)
    def _():
        acc_ref[...] = jnp.zeros_like(acc_ref)

    x = x_ref[...].astype(jnp.float32)
    xp = _pow_p(jnp.maximum(x, eps), p)          # clamp(min=eps) ** p

    def accumulate(v):
        if acc_w == 128:
            # Lane-wise partial sums: pure VPU adds of 128-lane column groups
            # into the wide accumulator; the cross-lane (XLU) reduction is
            # deferred to the epilogue.
            partial = v[:, 0:128]
            for g in range(1, hw_tile // 128):
                partial = partial + v[:, g * 128:(g + 1) * 128]
            acc_ref[...] += partial
        else:
            acc_ref[...] += jnp.sum(v, axis=-1, keepdims=True)

    if mask_cols:
        # Only the last spatial chunk is ragged -> only it pays for the
        # iota/compare/select.  Out-of-bounds *rows* never need masking: they
        # only feed output rows that are clamped away on writeback.
        @pl.when(k != n_k - 1)
        def _():
            accumulate(xp)

        @pl.when(k == n_k - 1)
        def _():
            col = k * hw_tile + lax.broadcasted_iota(
                jnp.int32, (row_tile, hw_tile), 1)
            accumulate(jnp.where(col < hw, xp, 0.0))
    else:
        accumulate(xp)

    @pl.when(k == n_k - 1)
    def _():
        total = acc_ref[...]
        if acc_w != 1:
            total = jnp.sum(total, axis=-1, keepdims=True)   # one XLU reduce
        mean_p = total * inv_hw                # adaptive_avg_pool2d(output_size=1)
        o_ref[...] = jnp.power(mean_p, 1.0 / p).astype(o_ref.dtype)


# Aim for >= 8 row tiles on the "parallel" axis so both TensorCores get work
# on megacore parts (v7x), whenever the row count allows it.
_MIN_ROW_TILES = 8


def _choose_tiles(rows, hw, itemsize, block_budget_bytes):
    """Pick (row_tile, hw_tile).  The budget is padding-aware: VMEM pads the
    lane axis to multiples of 128 and the sublane axis to multiples of 8."""
    hw_pad = _round_up(hw, 128)
    # Lane axis: take the whole spatial extent if an 8-row slab of the padded
    # tile fits the budget; otherwise chunk it in multiples of 128 lanes.
    if hw_pad * 8 * itemsize <= block_budget_bytes:
        hw_tile, hw_tile_pad = hw, hw_pad
    else:
        hw_tile = max(128, (block_budget_bytes // (8 * itemsize)) // 128 * 128)
        hw_tile_pad = hw_tile
    # Sublane axis: biggest multiple of 8 rows keeping the padded block within
    # budget (or all rows, always a legal block extent).
    max_rows = max(8, (block_budget_bytes // (hw_tile_pad * itemsize)) // 8 * 8)
    row_tile = rows if rows <= max_rows else max_rows
    # Cap row_tile so the parallel grid axis has >= _MIN_ROW_TILES tiles.
    if rows >= _MIN_ROW_TILES * 8:
        cap = max(8, (rows // _MIN_ROW_TILES) // 8 * 8)
        row_tile = min(row_tile, cap)
    return row_tile, hw_tile


def gem_pool(x, norm=3.0, eps=1e-6, row_tile=None, hw_tile=None,
             block_budget_bytes=8 * 1024 * 1024, vmem_limit_bytes=None):
    """GeneralizedMeanPooling forward. x: (N, C, H, W) -> (N, C, 1, 1)."""
    # TODO(synk): only output_size=1 (global GeM pooling) is implemented; general
    # adaptive output sizes of adaptive_avg_pool2d are not translated.
    p = float(norm)
    assert p > 0
    n, c, h, w = x.shape
    rows, hw = n * c, h * w
    x2d = x.reshape(rows, hw)        # contiguous view; no padding copy
    itemsize = x2d.dtype.itemsize

    auto_rt, auto_ht = _choose_tiles(rows, hw, itemsize, block_budget_bytes)
    rt = auto_rt if row_tile is None else int(row_tile)
    ht = auto_ht if hw_tile is None else int(hw_tile)

    grid = (pl.cdiv(rows, rt), pl.cdiv(hw, ht))
    mask_cols = (hw % ht) != 0

    # Wide (rt, 128) accumulator whenever the spatial chunk is 128-lane aligned
    # (hot loop stays on the VPU); fall back to (rt, 1) otherwise (that path is
    # only taken when the whole hw fits one chunk, so the reduce runs once).
    acc_w = 128 if (ht % 128 == 0 and 1 <= ht // 128 <= 64) else 1

    # Padding-aware VMEM footprint (lane pad 128, sublane pad 8, inputs and
    # outputs double-buffered by the pipeline) -> size the scoped VMEM limit.
    rt_pad, ht_pad = _round_up(rt, 8), _round_up(ht, 128)
    footprint = (2 * rt_pad * ht_pad * itemsize      # double-buffered input blocks
                 + 2 * rt_pad * 128 * itemsize       # double-buffered output blocks
                 + rt_pad * 128 * 4)                 # f32 accumulator scratch
    if vmem_limit_bytes is None:
        vmem_limit_bytes = int(min(max(footprint + (2 << 20), 16 << 20), 128 << 20))

    kernel = functools.partial(
        _gem_kernel, p=p, eps=float(eps), inv_hw=1.0 / float(hw), hw=hw,
        row_tile=rt, hw_tile=ht, acc_w=acc_w, mask_cols=mask_cols)

    is_int_p = p.is_integer() and 1 <= int(p) <= 64
    cost = pl.CostEstimate(
        flops=rows * hw * (2 + (max(int(p).bit_length(), 1) if is_int_p else 2)),
        transcendentals=rows + (0 if is_int_p else rows * hw),
        bytes_accessed=rows * hw * itemsize + rows * itemsize)

    out2d = pl.pallas_call(
        kernel,
        out_shape=jax.ShapeDtypeStruct((rows, 1), x.dtype),
        grid_spec=pltpu.PrefetchScalarGridSpec(
            num_scalar_prefetch=0,
            grid=grid,
            in_specs=[pl.BlockSpec((rt, ht), lambda i, k: (i, k))],
            out_specs=pl.BlockSpec((rt, 1), lambda i, k: (i, 0)),
            scratch_shapes=[pltpu.VMEM((rt, acc_w), jnp.float32)]),
        compiler_params=pltpu.CompilerParams(
            dimension_semantics=("parallel", "arbitrary"),
            vmem_limit_bytes=vmem_limit_bytes),
        cost_estimate=cost,
    )(x2d)

    return out2d.reshape(n, c, 1, 1)


if __name__ == "__main__":
    eps = 1e-6

    def ref_gem(x, p, eps):
        xp = jnp.power(jnp.maximum(x.astype(jnp.float32), eps), p)
        m = jnp.mean(xp, axis=(2, 3), keepdims=True)
        return jnp.power(m, 1.0 / p).astype(x.dtype)

    def check(out, ref):
        assert out.shape == ref.shape, (out.shape, ref.shape)
        assert jnp.allclose(out, ref, rtol=1e-4, atol=1e-5), (
            float(jnp.max(jnp.abs(out - ref))))

    # Case 1: nominal small shape, auto tiling (single block, wide accumulator).
    p = 3.0
    x = jax.random.normal(jax.random.PRNGKey(0), (2, 4, 16, 16), dtype=jnp.float32)
    out = jax.block_until_ready(gem_pool(x, norm=p, eps=eps))
    check(out, ref_gem(x, p, eps))

    # Case 2: ragged rows / spatial chunks (edge-block row clamping + ragged
    # last-chunk column masking + chunked accumulation, grid = (2, 2)).
    x2 = jax.random.normal(jax.random.PRNGKey(0), (2, 5, 10, 16), dtype=jnp.float32)
    out2 = jax.block_until_ready(
        gem_pool(x2, norm=p, eps=eps, row_tile=8, hw_tile=128))
    check(out2, ref_gem(x2, p, eps))

    # Case 3: hw < 128 and not lane-aligned (narrow (rt, 1) accumulator path).
    x3 = jax.random.normal(jax.random.PRNGKey(0), (2, 3, 7, 7), dtype=jnp.float32)
    out3 = jax.block_until_ready(gem_pool(x3, norm=p, eps=eps))
    check(out3, ref_gem(x3, p, eps))

    # Case 4: enough rows to exercise the parallel-axis split (grid[0] > 1).
    x4 = jax.random.normal(jax.random.PRNGKey(0), (4, 32, 16, 16), dtype=jnp.float32)
    out4 = jax.block_until_ready(gem_pool(x4, norm=p, eps=eps))
    check(out4, ref_gem(x4, p, eps))

    # Case 5: non-integer p (generic jnp.power path).
    p5 = 2.5
    x5 = jax.random.normal(jax.random.PRNGKey(0), (2, 4, 8, 16), dtype=jnp.float32)
    out5 = jax.block_until_ready(gem_pool(x5, norm=p5, eps=eps))
    check(out5, ref_gem(x5, p5, eps))

    print("KERNEL_OK")
</pallas_src>

<mosaic_0001>
module attributes {stable_mosaic.version = 11 : i64} {
  func.func @_gem_kernel(%arg0: i32, %arg1: i32, %arg2: memref<8x256xf32, #tpu.memory_space<vmem>>, %arg3: memref<8x1xf32, #tpu.memory_space<vmem>>, %arg4: memref<8x128xf32, #tpu.memory_space<vmem>>) attributes {dimension_semantics = [#tpu.dimension_semantics<parallel>, #tpu.dimension_semantics<arbitrary>], iteration_bounds = array<i64: 1, 1>, scalar_prefetch = 0 : i64, scratch_operands = 1 : i64, tpu.core_type = #tpu.core_type<tc>, window_params = [{transform_indices = @transform_0, window_bounds = array<i64: 8, 256>}, {transform_indices = @transform_1, window_bounds = array<i64: 8, 1>}]} {
    %c0_i32 = arith.constant 0 : i32
    %0 = arith.cmpi eq, %arg1, %c0_i32 : i32
    %1 = arith.extui %0 : i1 to i32
    %c0_i32_0 = arith.constant 0 : i32
    %2 = arith.cmpi ne, %1, %c0_i32_0 : i32
    scf.if %2 {
      %cst_8 = arith.constant 0.000000e+00 : f32
      %17 = vector.broadcast %cst_8 : f32 to vector<8x128xf32>
      %c0_9 = arith.constant 0 : index
      %c0_10 = arith.constant 0 : index
      %18 = vector.load %arg4[%c0_9, %c0_10] : memref<8x128xf32, #tpu.memory_space<vmem>>, vector<8x128xf32>
      tpu.vector_store %arg4[%c0_9, %c0_10], %17 {strides = array<i32>} : memref<8x128xf32, #tpu.memory_space<vmem>>, vector<8x128xf32>,
    } else {
    }
    %c0 = arith.constant 0 : index
    %c0_1 = arith.constant 0 : index
    %3 = vector.load %arg2[%c0, %c0_1] : memref<8x256xf32, #tpu.memory_space<vmem>>, vector<8x256xf32>
    %cst = arith.constant 9.99999997E-7 : f32
    %4 = vector.broadcast %cst : f32 to vector<8x256xf32>
    %5 = arith.maximumf %3, %4 : vector<8x256xf32>
    %6 = arith.mulf %5, %5 : vector<8x256xf32>
    %7 = arith.mulf %5, %6 : vector<8x256xf32>
    %8 = vector.extract_strided_slice %7 {offsets = [0, 0], sizes = [8, 128], strides = [1, 1]} : vector<8x256xf32> to vector<8x128xf32>
    %9 = vector.extract_strided_slice %7 {offsets = [0, 128], sizes = [8, 128], strides = [1, 1]} : vector<8x256xf32> to vector<8x128xf32>
    %10 = arith.addf %8, %9 : vector<8x128xf32>
    %c0_2 = arith.constant 0 : index
    %c0_3 = arith.constant 0 : index
    %11 = vector.load %arg4[%c0_2, %c0_3] : memref<8x128xf32, #tpu.memory_space<vmem>>, vector<8x128xf32>
    %12 = arith.addf %11, %10 : vector<8x128xf32>
    %c0_4 = arith.constant 0 : index
    %c0_5 = arith.constant 0 : index
    %13 = vector.load %arg4[%c0_4, %c0_5] : memref<8x128xf32, #tpu.memory_space<vmem>>, vector<8x128xf32>
    tpu.vector_store %arg4[%c0_4, %c0_5], %12 {strides = array<i32>} : memref<8x128xf32, #tpu.memory_space<vmem>>, vector<8x128xf32>,
    %c0_i32_6 = arith.constant 0 : i32
    %14 = arith.cmpi eq, %arg1, %c0_i32_6 : i32
    %15 = arith.extui %14 : i1 to i32
    %c0_i32_7 = arith.constant 0 : i32
    %16 = arith.cmpi ne, %15, %c0_i32_7 : i32
    scf.if %16 {
      %c0_8 = arith.constant 0 : index
      %c0_9 = arith.constant 0 : index
      %17 = vector.load %arg4[%c0_8, %c0_9] : memref<8x128xf32, #tpu.memory_space<vmem>>, vector<8x128xf32>
      %cst_10 = arith.constant dense<0.000000e+00> : vector<8xf32>
      %18 = vector.multi_reduction <add>, %17, %cst_10 [1] : vector<8x128xf32> to vector<8xf32>
      %19 = vector.shape_cast %18 : vector<8xf32> to vector<8x1xf32>
      %cst_11 = arith.constant 3.906250e-03 : f32
      %20 = vector.broadcast %cst_11 : f32 to vector<8x1xf32>
      %21 = arith.mulf %19, %20 : vector<8x1xf32>
      %cst_12 = arith.constant 0.333333343 : f32
      %22 = vector.broadcast %cst_12 : f32 to vector<8x1xf32>
      %23 = math.powf %21, %22 : vector<8x1xf32>
      %c0_13 = arith.constant 0 : index
      %c0_14 = arith.constant 0 : index
      %24 = vector.load %arg3[%c0_13, %c0_14] : memref<8x1xf32, #tpu.memory_space<vmem>>, vector<8x1xf32>
      tpu.vector_store %arg3[%c0_13, %c0_14], %23 {strides = array<i32>} : memref<8x1xf32, #tpu.memory_space<vmem>>, vector<8x1xf32>,
    } else {
    }
    return
  }
  func.func @transform_0(%arg0: i32, %arg1: i32) -> (i32, i32) {
    %c0_i32 = arith.constant 0 : i32
    return %arg0, %arg1 : i32, i32
  }
  func.func @transform_1(%arg0: i32, %arg1: i32) -> (i32, i32) {
    %c0_i32 = arith.constant 0 : i32
    %c0_i32_0 = arith.constant 0 : i32
    return %arg0, %c0_i32 : i32, i32
  }
}

</mosaic_0001>

<bundles_post_ra>
// kernel: tpu_custom_call.1
= control target key start
LH: loop header
LB: loop body
LE: loop exit
PB: predicated region body
PF: predicated region fallthrough
CT: control target
= control target key end

     0   :  { %6 = vsyncpa [#allocation4], 0  ;;  %s109_s9 = smov [#allocation3]   ;;  %s126_s0 = inlined_call_operand.hbm [shape: f32[8,256], index: 0, kind: input, shape index: {}]   ;;  %s127_s1 = inlined_call_operand.vmem [shape: f32[8,1], index: 1, kind: output, shape index: {}]  }
   0x1   :  { %s12_s8 = sshll.u32 %s126_s0, 4  ;;  %s14_s10 = sshll.u32 %s109_s9, 4  ;;  %s13_s8 = int_to_ptr.hbm [resolvable:$true] %s12_s8  ;;  %s15_s10 = int_to_ptr.vmem [resolvable:$true] %s14_s10 }
   0x2   :  { %17 = dma.hbm_to_vmem [thread:$0]  %s13_s8, 256, %s15_s10, [#allocation4]  }
   0x3   :  { %107 = dma.done.wait [#allocation4], 256  }
   0x4   :  { %108 = vsyncadd [#allocation4], 4294967040  ;;  %v27_v0 = vld [vmem:[#allocation3] sm:$0xff]  ;;  %v28_v1 = vld [vmem:[#allocation3 + $0x8] sm:$0xff]  ;;  %vm47_vm4 = vcmask 7168  }
   0x5   :  { %v29_v2 = vmax.f32 %v27_v0, 1e-06  ;;  %v30_v3 = vmax.f32 %v28_v1, 1e-06 }
   0x7   :  { %v31_v4 = vmul.f32 %v29_v2, %v29_v2  ;;  %v32_v5 = vmul.f32 %v30_v3, %v30_v3 }
   0x9   :  { %v33_v6 = vmul.f32 %v31_v4, %v29_v2  ;;  %v34_v7 = vmul.f32 %v32_v5, %v30_v3 }
   0xb   :  { %v35_v8 = vadd.f32 %v34_v7, %v33_v6 }
   0xd   :  { %43 = vadd.xlane.f32.xlu0 %v35_v8 }
  0x80   :  { %v44_v9 = vpop.xlane.xlu0 %43 }
  0x81   :  { %v45_v10 = vmul.f32 0.00390625, %v44_v9 }
  0x83   :  { %v56_v11 = vand.u32 2147483647, %v45_v10  ;;  %v73_v23 = vand.u32 2147483648, %v45_v10  ;;  %vm55_vm2 = vcmp.lt.f32.partialorder %v45_v10, 0.0  ;;  %vm54_vm3 = vcmp.eq.f32.partialorder %v45_v10, 0.0 }
  0x85   :  { %79 = vlog2.f32 %v56_v11  ;;  %vm70_vm0 = vweird.f32 %v56_v11  ;;  %vm72_vm1 = vcmp.eq.f32.partialorder %v56_v11, 0.0  ;;  %vm57_vm5 = vcmp.eq.f32.partialorder %v56_v11, inf }
  0x8b   :  { %v80_v12 = vpop.eup %79 }
  0x8c   :  { %v60_v13 = vmul.f32 -0.33333334, %v80_v12 }
  0x8e   :  { %81 = vpow2.f32 %v60_v13 }
  0x94   :  { %v82_v14 = vpop.eup %81 }
  0x95   :  { %v62_v15 = vmul.f32 %v82_v14, %v82_v14 }
  0x97   :  { %v63_v16 = vmul.f32 %v62_v15, %v56_v11 }
  0x99   :  { %v64_v17 = vmul.f32 %v63_v16, %v62_v15 }
  0x9b   :  { %v65_v18 = vsub.f32 %v64_v17, %v82_v14 }
  0x9d   :  { %v66_v19 = vmul.f32 -0.33333334, %v65_v18 }
  0x9f   :  { %v67_v20 = vadd.f32 %v82_v14, %v66_v19 }
  0xa1   :  { %v68_v21 = vmul.f32 %v67_v20, %v45_v10 }
  0xa3   :  { %v69_v22 = vmul.f32 %v68_v21, %v67_v20 }
  0xa5   :  { %v71_v24 = vsel %vm70_vm0, %v45_v10, %v69_v22 }
  0xa6   :  { %v74_v25 = vsel %vm72_vm1, %v73_v23, %v71_v24 }
  0xa7   :  { %v75_v26 = vsel %vm55_vm2, nan, %v74_v25 }
  0xa8   :  { %v76_v27 = vsel %vm54_vm3, 0.0, %v75_v26 }
  0xa9   :  { %v77_v28 = vsel %vm57_vm5, inf, %v76_v27 }
  0xaa   :  { %48 = vst.msk [vmem:[%s127_s1] sm:$0xff] %vm47_vm4, %v77_v28 }
  0xab   :  { %53 = vsyncpa [#allocation4], 1 }

</bundles_post_ra>
